<compile_context>
chip_gen: v7x
topology: tpu7x:2x2x1
jax: 0.10.0
libtpu: 0.0.40
codegen_flags: <defaults>
</compile_context>

<pallas_src>
import jax
import jax.numpy as jnp
from jax.experimental import pallas as pl
from jax.experimental.pallas import tpu as pltpu

# Problem sizes (small, consistent with the module: kernel sizes 3,3,2 imply
# L=6 so that the final spatial dim is 1 and squeeze(2) yields (B, 1)).
B = 2
L = 6          # sequence length
F = 4          # feature_num
C1, C2, C3 = 64, 128, 1
K1, K2, K3 = 3, 3, 2
L1 = L - K1 + 1          # 4
L2 = L1 - K2 + 1         # 2
L3 = L2 - K3 + 1         # 1
assert L3 == 1, "squeeze(2) semantics of the module require L == 6 (final spatial len 1)"

XF = L * F               # 24  flattened input length per batch row
LC1 = L1 * C1            # 256 flattened conv1 output per batch row
LC2 = L2 * C2            # 256 flattened conv2 output per batch row

# Packed parameter-buffer layout (rows x 256 lanes, f32). Section starts are
# multiples of 8 so every in-kernel ref slice is sublane-tile aligned.
W1_ROW0 = 0                      # rows [0, 24)   : W1_big
B1_ROW = XF                      # row  24        : b1 tiled over L1
W2_ROW0 = 32                     # rows [32, 288) : W2_big
TAIL_ROW0 = W2_ROW0 + LC1        # rows [288, 296): [b2_tiled ; w3_flat ; b3 ; pad]
PARAM_ROWS = TAIL_ROW0 + 8       # 296


def substrate_feat_kernel(x_ref, p_ref, o_ref):
    x = x_ref[...]                                   # (B, 24)

    w1 = p_ref[W1_ROW0:W1_ROW0 + XF, :]              # (24, 256)   aligned slice
    b1 = p_ref[B1_ROW:B1_ROW + 1, :]                 # (1, 256)    starts at row 24
    w2 = p_ref[W2_ROW0:W2_ROW0 + LC1, :]             # (256, 256)  aligned slice
    tail = p_ref[TAIL_ROW0:TAIL_ROW0 + 8, :]         # (8, 256)    one aligned load
    b2 = tail[0:1, :]                                # (1, 256)
    w3 = tail[1:2, :]                                # (1, 256)
    b3 = tail[2:3, 0:1]                              # (1, 1)

    # Conv1d(F->64, k=3) + ReLU: one MXU push, bias added on the VPU.
    h1 = jnp.maximum(
        jnp.dot(x, w1, preferred_element_type=jnp.float32) + b1, 0.0)        # (B, 256)

    # Conv1d(64->128, k=3) + ReLU: one MXU push.
    h2 = jnp.maximum(
        jnp.dot(h1, w2, preferred_element_type=jnp.float32) + b2, 0.0)       # (B, 256)

    # Conv1d(128->1, k=2): C_out = 1 and the receptive field is all of h2,
    # so it is a VPU multiply + XLU lane reduction (no MXU pass needed).
    out = jnp.sum(h2 * w3, axis=-1, keepdims=True) + b3                      # (B, 1)
    o_ref[...] = out.astype(o_ref.dtype)


def prepare_params(w1, b1, w2, b2, w3, b3):
    """One-time parameter preparation (weights in PyTorch Conv1d layout (C_out, C_in, K)).

    Returns a single packed (PARAM_ROWS, 256) f32 buffer ready for the kernel.
    """
    w1 = jnp.asarray(w1, jnp.float32); b1 = jnp.asarray(b1, jnp.float32)
    w2 = jnp.asarray(w2, jnp.float32); b2 = jnp.asarray(b2, jnp.float32)
    w3 = jnp.asarray(w3, jnp.float32); b3 = jnp.asarray(b3, jnp.float32)

    # Conv1 as a single matmul: W1_big[l*F + f, p*C1 + c] = w1[c, f, l-p] (0 <= l-p < K1).
    w1t = jnp.transpose(w1, (2, 1, 0))                     # (K1, F, C1)
    W1_big = jnp.zeros((L, F, L1, C1), jnp.float32)
    for p in range(L1):
        W1_big = W1_big.at[p:p + K1, :, p, :].set(w1t)
    W1_big = W1_big.reshape(XF, LC1)                       # (24, 256)
    b1_tiled = jnp.tile(b1, L1)                            # b1_tiled[p*C1 + c] = b1[c]

    # Conv2 as a single matmul: W2_big[p*C1 + c1, q*C2 + c2] = w2[c2, c1, p-q] (0 <= p-q < K2).
    w2t = jnp.transpose(w2, (2, 1, 0))                     # (K2, C1, C2)
    W2_big = jnp.zeros((L1, C1, L2, C2), jnp.float32)
    for q in range(L2):
        W2_big = W2_big.at[q:q + K2, :, q, :].set(w2t)
    W2_big = W2_big.reshape(LC1, LC2)                      # (256, 256)

    b2_tiled = jnp.tile(b2, L2)                            # (256,)
    w3_flat = jnp.transpose(w3, (2, 1, 0)).reshape(LC2)    # w3_flat[q*C2 + c2] = w3[0, c2, q]
    b3_row = jnp.full((LC2,), b3[0], jnp.float32)          # only lane 0 is read

    params = jnp.zeros((PARAM_ROWS, LC1), jnp.float32)
    params = params.at[W1_ROW0:W1_ROW0 + XF, :].set(W1_big)
    params = params.at[B1_ROW, :].set(b1_tiled)
    params = params.at[W2_ROW0:W2_ROW0 + LC1, :].set(W2_big)
    params = params.at[TAIL_ROW0 + 0, :].set(b2_tiled)
    params = params.at[TAIL_ROW0 + 1, :].set(w3_flat)
    params = params.at[TAIL_ROW0 + 2, :].set(b3_row)
    return params


@jax.jit
def substrate_feat(x, params):
    """x: (B, L, F) -- the PyTorch input *before* its internal transpose."""
    bsz = x.shape[0]
    x_flat = x.reshape(bsz, XF).astype(jnp.float32)        # only per-call wrapper op

    vmem = pl.BlockSpec(memory_space=pltpu.MemorySpace.VMEM)
    return pl.pallas_call(
        substrate_feat_kernel,
        out_shape=jax.ShapeDtypeStruct((bsz, 1), jnp.float32),
        in_specs=[vmem, vmem],
        out_specs=vmem,
    )(x_flat, params)
    # TODO(synk): for realistic batch sizes, add a batch grid (tile ~512 rows,
    # dimension_semantics=("parallel",)) so v7x's second TensorCore is used; at
    # B=2 a grid would only add per-step overhead.


def reference_forward(x, w1, b1, w2, b2, w3, b3):
    """Pure-JAX reference matching the PyTorch module exactly (NCW convs)."""
    xt = jnp.transpose(x, (0, 2, 1))       # (B, F, L)

    def conv1d(inp, w, b):
        out = jax.lax.conv_general_dilated(
            inp, w, window_strides=(1,), padding="VALID",
            dimension_numbers=("NCH", "OIH", "NCH"))
        return out + b[None, :, None]

    h = jax.nn.relu(conv1d(xt, w1, b1))
    h = jax.nn.relu(conv1d(h, w2, b2))
    h = conv1d(h, w3, b3)                  # (B, 1, 1)
    return h[:, :, 0]                      # squeeze(2) -> (B, 1)


if __name__ == "__main__":
    key = jax.random.PRNGKey(0)
    ks = jax.random.split(key, 7)

    def uinit(k, shape, fan_in):
        lim = 1.0 / (fan_in ** 0.5)        # PyTorch Conv1d default init range
        return jax.random.uniform(k, shape, jnp.float32, -lim, lim)

    x = jax.random.normal(ks[0], (B, L, F), jnp.float32)
    w1 = uinit(ks[1], (C1, F, K1), F * K1);   b1 = uinit(ks[2], (C1,), F * K1)
    w2 = uinit(ks[3], (C2, C1, K2), C1 * K2); b2 = uinit(ks[4], (C2,), C1 * K2)
    w3 = uinit(ks[5], (C3, C2, K3), C2 * K3); b3 = uinit(ks[6], (C3,), C2 * K3)

    # One-time parameter preparation (hoisted out of the per-call path).
    params = jax.block_until_ready(prepare_params(w1, b1, w2, b2, w3, b3))

    out = jax.block_until_ready(substrate_feat(x, params))

    ref = reference_forward(x, w1, b1, w2, b2, w3, b3)
    assert out.shape == (B, 1), out.shape
    assert jnp.allclose(out, ref, atol=1e-3, rtol=1e-3), (out, ref)
    print("KERNEL_OK")
</pallas_src>

<mosaic_0001>
module attributes {stable_mosaic.version = 11 : i64} {
  func.func @substrate_feat_kernel(%arg0: memref<2x24xf32, #tpu.memory_space<vmem>>, %arg1: memref<296x256xf32, #tpu.memory_space<vmem>>, %arg2: memref<2x1xf32, #tpu.memory_space<vmem>>) attributes {dimension_semantics = [], scalar_prefetch = 0 : i64, scratch_operands = 0 : i64, tpu.core_type = #tpu.core_type<tc>} {
    %c0 = arith.constant 0 : index
    %c0_0 = arith.constant 0 : index
    %0 = vector.load %arg0[%c0, %c0_0] : memref<2x24xf32, #tpu.memory_space<vmem>>, vector<2x24xf32>
    %c0_1 = arith.constant 0 : index
    %c0_2 = arith.constant 0 : index
    %1 = vector.load %arg1[%c0_1, %c0_2] : memref<296x256xf32, #tpu.memory_space<vmem>>, vector<24x256xf32>
    %c24 = arith.constant 24 : index
    %c0_3 = arith.constant 0 : index
    %2 = vector.load %arg1[%c24, %c0_3] : memref<296x256xf32, #tpu.memory_space<vmem>>, vector<1x256xf32>
    %c32 = arith.constant 32 : index
    %c0_4 = arith.constant 0 : index
    %3 = vector.load %arg1[%c32, %c0_4] : memref<296x256xf32, #tpu.memory_space<vmem>>, vector<256x256xf32>
    %c288 = arith.constant 288 : index
    %c0_5 = arith.constant 0 : index
    %4 = vector.load %arg1[%c288, %c0_5] : memref<296x256xf32, #tpu.memory_space<vmem>>, vector<8x256xf32>
    %5 = vector.extract_strided_slice %4 {offsets = [0, 0], sizes = [1, 256], strides = [1, 1]} : vector<8x256xf32> to vector<1x256xf32>
    %6 = vector.extract_strided_slice %4 {offsets = [1, 0], sizes = [1, 256], strides = [1, 1]} : vector<8x256xf32> to vector<1x256xf32>
    %7 = vector.extract_strided_slice %4 {offsets = [2, 0], sizes = [1, 1], strides = [1, 1]} : vector<8x256xf32> to vector<1x1xf32>
    %cst = arith.constant dense<0.000000e+00> : vector<2x256xf32>
    %8 = tpu.matmul %0, %1, %cst {dimension_numbers = #tpu.dot_dimension_numbers<[1], [0], [0], [1], [0, 0, 1, 1], [], []>} : vector<2x24xf32>, vector<24x256xf32>, vector<2x256xf32> -> vector<2x256xf32>
    %9 = vector.broadcast %2 : vector<1x256xf32> to vector<2x256xf32>
    %10 = arith.addf %8, %9 : vector<2x256xf32>
    %cst_6 = arith.constant 0.000000e+00 : f32
    %11 = vector.broadcast %cst_6 : f32 to vector<2x256xf32>
    %12 = arith.maximumf %10, %11 : vector<2x256xf32>
    %cst_7 = arith.constant dense<0.000000e+00> : vector<2x256xf32>
    %13 = tpu.matmul %12, %3, %cst_7 {dimension_numbers = #tpu.dot_dimension_numbers<[1], [0], [0], [1], [0, 0, 1, 1], [], []>} : vector<2x256xf32>, vector<256x256xf32>, vector<2x256xf32> -> vector<2x256xf32>
    %14 = vector.broadcast %5 : vector<1x256xf32> to vector<2x256xf32>
    %15 = arith.addf %13, %14 : vector<2x256xf32>
    %cst_8 = arith.constant 0.000000e+00 : f32
    %16 = vector.broadcast %cst_8 : f32 to vector<2x256xf32>
    %17 = arith.maximumf %15, %16 : vector<2x256xf32>
    %18 = vector.broadcast %6 : vector<1x256xf32> to vector<2x256xf32>
    %19 = arith.mulf %17, %18 : vector<2x256xf32>
    %cst_9 = arith.constant dense<0.000000e+00> : vector<2xf32>
    %20 = vector.multi_reduction <add>, %19, %cst_9 [1] : vector<2x256xf32> to vector<2xf32>
    %21 = vector.shape_cast %20 : vector<2xf32> to vector<2x1xf32>
    %22 = vector.broadcast %7 : vector<1x1xf32> to vector<2x1xf32>
    %23 = arith.addf %21, %22 : vector<2x1xf32>
    %c0_10 = arith.constant 0 : index
    %c0_11 = arith.constant 0 : index
    %24 = vector.load %arg2[%c0_10, %c0_11] : memref<2x1xf32, #tpu.memory_space<vmem>>, vector<2x1xf32>
    tpu.vector_store %arg2[%c0_10, %c0_11], %23 {strides = array<i32>} : memref<2x1xf32, #tpu.memory_space<vmem>>, vector<2x1xf32>,
    return
  }
}

</mosaic_0001>

<bundles_post_ra>
// kernel: substrate_feat.1
= control target key start
LH: loop header
LB: loop body
LE: loop exit
PB: predicated region body
PF: predicated region fallthrough
CT: control target
= control target key end

     0   :  { %7 = vsyncpa [#allocation3], 0  ;;  %s394_s9 = smov [#allocation2]   ;;  %s431_s0 = inlined_call_operand.vmem [shape: f32[2,24], index: 0, kind: input, shape index: {}]   ;;  %s432_s1 = inlined_call_operand.hbm [shape: f32[296,256], index: 1, kind: input, shape index: {}]   ;;  %s433_s2 = inlined_call_operand.vmem [shape: f32[2,1], index: 2, kind: output, shape index: {}]  }
   0x1   :  { %s15_s10 = sshll.u32 %s394_s9, 4  ;;  %s370_s13 = scalar_lea.hbm %s432_s1, 9472  ;;  %s16_s10 = int_to_ptr.vmem [resolvable:$true] %s15_s10 }
   0x2   :  { %p371_p0 = scmp.ne.s32.totalorder %s432_s1, %s370_s13  ;;  %p374_p1 = scmp.lt.u32.totalorder %s370_s13, %s432_s1 }
   0x4   :  { %p376_p2 = pnand %p374_p1, %p371_p0 }
   0x6   :  { %379 = shalt.err (!%p376_p2)
}
   0x7   :  { %s380_s18 = scalar_lea.vmem %s16_s10, 9472  ;;  %p385_p4 = scmp.lt.s32.totalorder %s16_s10, %s16_s10 }
   0x8   :  { %p381_p3 = scmp.ne.s32.totalorder %s16_s10, %s380_s18  ;;  %p386_p5 = scmp.lt.s32.totalorder %s380_s18, %s380_s18 }
   0xa   :  { %p387_p6 = por %p386_p5, %p385_p4 }
   0xc   :  { %p388_p7 = pnand %p387_p6, %p381_p3 }
   0xe   :  { %391 = shalt.err (!%p388_p7)
}
   0xf   :  { %s395_s19 = smov 256   ;;  %s396_s20 = smov 16  }
  0x10   :  { %21 = dma.hbm_to_vmem [thread:$0]  %s432_s1, 9472, %s16_s10, [#allocation3], %s395_s19, %s395_s19, %s396_s20  }
  0x11   :  { %392 = dma.done.wait [#allocation3], 9472  }
  0x12   :  { %393 = vsyncadd [#allocation3], 4294957824  ;;  %v397_v0 = vmov 0.0   ;;  %v27_v1 = vld [vmem:[#allocation2 + $0x8] sm:$0xff]  ;;  %v29_v2 = vld [vmem:[#allocation2 + $0x18] sm:$0xff]  ;;  %vm111_vm0 = vcmask 195584  }
  0x13   :  { %179 = vmatprep.mubr.f32.mxu0 %v397_v0  ;;  %v26_v3 = vld [vmem:[#allocation2] sm:$0xff]  ;;  %v298_v4 = vpack.c.bf16 %v29_v2, %v27_v1  ;;  %v28_v5 = vld [vmem:[#allocation2 + $0x10] sm:$0xff]  ;;  %v31_v7 = vld [vmem:[#allocation2 + $0x28] sm:$0xff]  ;;  %vm279_vm1 = vcmask 1041408   ;;  %vm290_vm2 = vcmask 1024  }
  0x14   :  { %v300_v6 = vpack.c.bf16 %v28_v5, %v26_v3  ;;  %v35_v8 = vld [vmem:[#allocation2 + $0x48] sm:$0xff]  ;;  %v37_v9 = vld [vmem:[#allocation2 + $0x58] sm:$0xff]  ;;  %v34_v11 = vld [vmem:[#allocation2 + $0x40] sm:$0xff] }
  0x15   :  { %299 = vmatprep.subr.bf16.mxu0 %v298_v4  ;;  %v302_v10 = vpack.c.bf16 %v37_v9, %v35_v8  ;;  %v36_v12 = vld [vmem:[#allocation2 + $0x50] sm:$0xff]  ;;  %v39_v13 = vld [vmem:[#allocation2 + $0x68] sm:$0xff]  ;;  %v41_v15 = vld [vmem:[#allocation2 + $0x78] sm:$0xff] }
  0x16   :  { %301 = vmatpush1.bf16.msra.mxu0 %v300_v6  ;;  %v304_v14 = vpack.c.bf16 %v36_v12, %v34_v11  ;;  %v38_v16 = vld [vmem:[#allocation2 + $0x60] sm:$0xff]  ;;  %v40_v17 = vld [vmem:[#allocation2 + $0x70] sm:$0xff]  ;;  %v306_v19 = vpack.c.bf16 %v41_v15, %v39_v13  ;;  %v43_v20 = vld [vmem:[#allocation2 + $0x88] sm:$0xff] }
  0x17   :  { %119 = vmatprep.subr.mxu0 %v31_v7  ;;  %v30_v18 = vld [vmem:[#allocation2 + $0x20] sm:$0xff]  ;;  %303 = vmatprep.subr.bf16.mxu1 %v302_v10  ;;  %v45_v21 = vld [vmem:[#allocation2 + $0x98] sm:$0xff]  ;;  %v308_v23 = vpack.c.bf16 %v40_v17, %v38_v16  ;;  %v44_v26 = vld [vmem:[#allocation2 + $0x90] sm:$0xff] }
  0x18   :  { %v25_v22 = vld [vmem:[%s431_s0] sm:$0x3]  ;;  %305 = vmatpush1.bf16.msra.mxu1 %v304_v14  ;;  %v310_v24 = vpack.c.bf16 %v45_v21, %v43_v20  ;;  %v47_v27 = vld [vmem:[#allocation2 + $0xa8] sm:$0xff]  ;;  %v49_v28 = vld [vmem:[#allocation2 + $0xb8] sm:$0xff] }
  0x19   :  { %307 = vmatprep.subr.bf16.mxu1 %v306_v19  ;;  %v42_v25 = vld [vmem:[#allocation2 + $0x80] sm:$0xff]  ;;  %v314_v30 = vpack.c.bf16 %v49_v28, %v47_v27  ;;  %v48_v32 = vld [vmem:[#allocation2 + $0xb0] sm:$0xff]  ;;  %v51_v33 = vld [vmem:[#allocation2 + $0xc8] sm:$0xff] }
  0x1a   :  { %120 = vmatpush1.msra.mxu0 %v30_v18  ;;  %v312_v29 = vpack.c.bf16 %v44_v26, %v42_v25  ;;  %v46_v31 = vld [vmem:[#allocation2 + $0xa0] sm:$0xff]  ;;  %v53_v34 = vld [vmem:[#allocation2 + $0xd8] sm:$0xff]  ;;  %v52_v38 = vld [vmem:[#allocation2 + $0xd0] sm:$0xff] }
  0x1b   :  { %297 = vmatmul.mubr.msk.f32.vlgmr.msra.gmra.mrb[0].mxu0 %vm111_vm0, %v25_v22  ;;  %v316_v35 = vpack.c.bf16 %v48_v32, %v46_v31  ;;  %v318_v36 = vpack.c.bf16 %v53_v34, %v51_v33  ;;  %v50_v37 = vld [vmem:[#allocation2 + $0xc0] sm:$0xff]  ;;  %v55_v39 = vld [vmem:[#allocation2 + $0xe8] sm:$0xff]  ;;  %v57_v40 = vld [vmem:[#allocation2 + $0xf8] sm:$0xff] }
  0x1c   :  { %309 = vmatpush1.bf16.msra.mxu1 %v308_v23  ;;  %v320_v41 = vpack.c.bf16 %v52_v38, %v50_v37  ;;  %v322_v42 = vpack.c.bf16 %v57_v40, %v55_v39  ;;  %v54_v43 = vld [vmem:[#allocation2 + $0xe0] sm:$0xff]  ;;  %v56_v44 = vld [vmem:[#allocation2 + $0xf0] sm:$0xff]  ;;  %v59_v45 = vld [vmem:[#allocation2 + $0x108] sm:$0xff] }
  0x1d   :  { %311 = vmatprep.subr.bf16.mxu1 %v310_v24  ;;  %v61_v46 = vld [vmem:[#allocation2 + $0x118] sm:$0xff]  ;;  %v324_v47 = vpack.c.bf16 %v56_v44, %v54_v43  ;;  %v58_v49 = vld [vmem:[#allocation2 + $0x100] sm:$0xff]  ;;  %v60_v50 = vld [vmem:[#allocation2 + $0x110] sm:$0xff] }
  0x1e   :  { %v326_v48 = vpack.c.bf16 %v61_v46, %v59_v45  ;;  %v63_v51 = vld [vmem:[#allocation2 + $0x128] sm:$0xff]  ;;  %v65_v52 = vld [vmem:[#allocation2 + $0x138] sm:$0xff]  ;;  %v328_v53 = vpack.c.bf16 %v60_v50, %v58_v49  ;;  %v62_v55 = vld [vmem:[#allocation2 + $0x120] sm:$0xff] }
  0x1f   :  { %v330_v54 = vpack.c.bf16 %v65_v52, %v63_v51  ;;  %v64_v56 = vld [vmem:[#allocation2 + $0x130] sm:$0xff]  ;;  %v67_v57 = vld [vmem:[#allocation2 + $0x148] sm:$0xff]  ;;  %v69_v58 = vld [vmem:[#allocation2 + $0x158] sm:$0xff] }
  0x20   :  { %313 = vmatpush1.bf16.msra.mxu1 %v312_v29  ;;  %v332_v59 = vpack.c.bf16 %v64_v56, %v62_v55  ;;  %v334_v60 = vpack.c.bf16 %v69_v58, %v67_v57  ;;  %v66_v61 = vld [vmem:[#allocation2 + $0x140] sm:$0xff]  ;;  %v68_v62 = vld [vmem:[#allocation2 + $0x150] sm:$0xff]  ;;  %v71_v63 = vld [vmem:[#allocation2 + $0x168] sm:$0xff] }
  0x21   :  { %315 = vmatprep.subr.bf16.mxu1 %v314_v30  ;;  %v73_v0 = vld [vmem:[#allocation2 + $0x178] sm:$0xff]  ;;  %v336_v1 = vpack.c.bf16 %v68_v62, %v66_v61  ;;  %v70_v3 = vld [vmem:[#allocation2 + $0x160] sm:$0xff]  ;;  %v72_v4 = vld [vmem:[#allocation2 + $0x170] sm:$0xff] }
  0x22   :  { %v338_v2 = vpack.c.bf16 %v73_v0, %v71_v63  ;;  %v75_v5 = vld [vmem:[#allocation2 + $0x188] sm:$0xff]  ;;  %v77_v6 = vld [vmem:[#allocation2 + $0x198] sm:$0xff]  ;;  %v340_v7 = vpack.c.bf16 %v72_v4, %v70_v3  ;;  %v74_v9 = vld [vmem:[#allocation2 + $0x180] sm:$0xff] }
  0x23   :  { %v342_v8 = vpack.c.bf16 %v77_v6, %v75_v5  ;;  %v76_v10 = vld [vmem:[#allocation2 + $0x190] sm:$0xff]  ;;  %v79_v11 = vld [vmem:[#allocation2 + $0x1a8] sm:$0xff]  ;;  %v81_v12 = vld [vmem:[#allocation2 + $0x1b8] sm:$0xff] }
  0x24   :  { %317 = vmatpush1.bf16.msra.mxu1 %v316_v35  ;;  %v344_v13 = vpack.c.bf16 %v76_v10, %v74_v9  ;;  %v346_v14 = vpack.c.bf16 %v81_v12, %v79_v11  ;;  %v78_v15 = vld [vmem:[#allocation2 + $0x1a0] sm:$0xff]  ;;  %v80_v16 = vld [vmem:[#allocation2 + $0x1b0] sm:$0xff]  ;;  %v83_v17 = vld [vmem:[#allocation2 + $0x1c8] sm:$0xff] }
  0x25   :  { %319 = vmatprep.subr.bf16.mxu1 %v318_v36  ;;  %v85_v18 = vld [vmem:[#allocation2 + $0x1d8] sm:$0xff]  ;;  %v348_v19 = vpack.c.bf16 %v80_v16, %v78_v15  ;;  %v82_v21 = vld [vmem:[#allocation2 + $0x1c0] sm:$0xff]  ;;  %v84_v22 = vld [vmem:[#allocation2 + $0x1d0] sm:$0xff] }
  0x26   :  { %v350_v20 = vpack.c.bf16 %v85_v18, %v83_v17  ;;  %v87_v23 = vld [vmem:[#allocation2 + $0x1e8] sm:$0xff]  ;;  %v89_v24 = vld [vmem:[#allocation2 + $0x1f8] sm:$0xff]  ;;  %v352_v25 = vpack.c.bf16 %v84_v22, %v82_v21  ;;  %v86_v27 = vld [vmem:[#allocation2 + $0x1e0] sm:$0xff] }
  0x27   :  { %v354_v26 = vpack.c.bf16 %v89_v24, %v87_v23  ;;  %v88_v28 = vld [vmem:[#allocation2 + $0x1f0] sm:$0xff]  ;;  %v91_v29 = vld [vmem:[#allocation2 + $0x208] sm:$0xff]  ;;  %v93_v30 = vld [vmem:[#allocation2 + $0x218] sm:$0xff] }
  0x28   :  { %321 = vmatpush1.bf16.msra.mxu1 %v320_v41  ;;  %v356_v31 = vpack.c.bf16 %v88_v28, %v86_v27  ;;  %v358_v32 = vpack.c.bf16 %v93_v30, %v91_v29  ;;  %v90_v33 = vld [vmem:[#allocation2 + $0x200] sm:$0xff]  ;;  %v92_v34 = vld [vmem:[#allocation2 + $0x210] sm:$0xff]  ;;  %v95_v36 = vld [vmem:[#allocation2 + $0x228] sm:$0xff] }
  0x29   :  { %323 = vmatprep.subr.bf16.mxu1 %v322_v42  ;;  %v360_v35 = vpack.c.bf16 %v92_v34, %v90_v33  ;;  %v97_v37 = vld [vmem:[#allocation2 + $0x238] sm:$0xff]  ;;  %v94_v39 = vld [vmem:[#allocation2 + $0x220] sm:$0xff]  ;;  %v96_v40 = vld [vmem:[#allocation2 + $0x230] sm:$0xff]  ;;  %v101_v42 = vlaneseq }
  0x2a   :  { %v362_v38 = vpack.c.bf16 %v97_v37, %v95_v36  ;;  %v364_v41 = vpack.c.bf16 %v96_v40, %v94_v39  ;;  %v33_v45 = vld [vmem:[#allocation2 + $0x30] ss:$8 sm:$0x3]  ;;  %v98_v55 = vld [vmem:[#allocation2 + $0x240] sm:$0xff]  ;;  %v99_v56 = vld [vmem:[#allocation2 + $0x248] sm:$0xff] }
  0x2b   :  { %v102_v43 = vshrl.u32 %v101_v42, 7 }
  0x2c   :  { %325 = vmatpush1.bf16.msra.mxu1 %v324_v47 }
  0x2d   :  { %327 = vmatprep.subr.bf16.mxu1 %v326_v48  ;;  %v103_v44 = vsub.s32 0, %v102_v43  ;;  %v107_v46 = vsub.s32 1, %v102_v43 }
  0x2f   :  { %v104_v47 = vrot.slane %v33_v45, %v103_v44  ;;  %v108_v48 = vrot.slane %v33_v45, %v107_v46  ;;  %v191_v57 = vrot.slane %v98_v55, %v103_v44  ;;  %v195_v58 = vrot.slane %v99_v56, %v103_v44 }
  0x30   :  { %329 = vmatpush1.bf16.msra.mxu1 %v328_v53  ;;  %v272_v62 = vrot.slane %v98_v55, %v107_v46  ;;  %v276_v0 = vrot.slane %v99_v56, %v107_v46 }
  0x31   :  { %331 = vmatprep.subr.bf16.mxu1 %v330_v54 }
  0x34   :  { %333 = vmatpush1.bf16.msra.mxu1 %v332_v59 }
  0x35   :  { %335 = vmatprep.subr.bf16.mxu1 %v334_v60 }
  0x38   :  { %337 = vmatpush1.bf16.msra.mxu1 %v336_v1 }
  0x39   :  { %339 = vmatprep.subr.bf16.mxu1 %v338_v2 }
  0x3c   :  { %341 = vmatpush1.bf16.msra.mxu1 %v340_v7 }
  0x3d   :  { %343 = vmatprep.subr.bf16.mxu1 %v342_v8  ;;  %v287_v8 = vsub.s32 2, %v102_v43 }
  0x3f   :  { %v288_v9 = vrot.slane %v98_v55, %v287_v8 }
  0x40   :  { %345 = vmatpush1.bf16.msra.mxu1 %v344_v13 }
  0x41   :  { %347 = vmatprep.subr.bf16.mxu1 %v346_v14 }
  0x44   :  { %349 = vmatpush1.bf16.msra.mxu1 %v348_v19 }
  0x45   :  { %351 = vmatprep.subr.bf16.mxu1 %v350_v20 }
  0x48   :  { %353 = vmatpush1.bf16.msra.mxu1 %v352_v25 }
  0x49   :  { %355 = vmatprep.subr.bf16.mxu1 %v354_v26 }
  0x4c   :  { %357 = vmatpush1.bf16.msra.mxu1 %v356_v31 }
  0x4d   :  { %359 = vmatprep.subr.bf16.mxu1 %v358_v32 }
  0x50   :  { %361 = vmatpush1.bf16.msra.mxu1 %v360_v35 }
  0x51   :  { %363 = vmatprep.subr.bf16.mxu1 %v362_v38 }
  0x54   :  { %365 = vmatpush1.bf16.msra.mxu1 %v364_v41 }
  0xee   :  { %v181_v49 = vpop.f32.mrb[0].mxu0 }
  0xef   :  { %v182_v50 = vadd.f32 %v181_v49, %v104_v47  ;;  %v183_v51 = vpop.f32.mrb[1].mxu0 }
  0xf0   :  { %v184_v52 = vadd.f32 %v183_v51, %v108_v48 }
  0xf1   :  { %v186_v54 = vmax.f32 %v182_v50, 0.0 }
  0xf2   :  { %v187_v53 = vmax.f32 %v184_v52, 0.0 }
  0xf4   :  { %260 = vmatprep.mubr.f32.mxu1 %v187_v53 }
  0xf5   :  { %261 = vmatmul.mubr.f32.vlgmr.msra.gmra.mrb[0].mxu1 %v186_v54 }
 0x1c8   :  { %v262_v59 = vpop.f32.mrb[0].mxu1 }
 0x1c9   :  { %v263_v60 = vadd.f32 %v262_v59, %v191_v57  ;;  %v264_v61 = vpop.f32.mrb[1].mxu1 }
 0x1ca   :  { %v265_v63 = vadd.f32 %v264_v61, %v195_v58 }
 0x1cb   :  { %v267_v1 = vmax.f32 %v263_v60, 0.0 }
 0x1cc   :  { %v268_v2 = vmax.f32 %v265_v63, 0.0 }
 0x1cd   :  { %v277_v3 = vmul.f32 %v272_v62, %v267_v1 }
 0x1ce   :  { %v278_v4 = vmul.f32 %v276_v0, %v268_v2 }
 0x1cf   :  { %v280_v5 = vsel %vm279_vm1, %v277_v3, 0.0 }
 0x1d0   :  { %v281_v6 = vsel %vm279_vm1, %v278_v4, 0.0 }
 0x1d1   :  { %v282_v7 = vadd.f32 %v281_v6, %v280_v5 }
 0x1d3   :  { %283 = vadd.xlane.f32.xlu0 %v282_v7 }
 0x260   :  { %v284_v10 = vpop.xlane.xlu0 %283 }
 0x261   :  { %v289_v11 = vadd.f32 %v288_v9, %v284_v10 }
 0x263   :  { %291 = vst.msk [vmem:[%s433_s2] sm:$0x3] %vm290_vm2, %v289_v11 }
 0x264   :  { %296 = vsyncpa [#allocation3], 1 }

</bundles_post_ra>
